<compile_context>
chip_gen: v5e
topology: v5e:2x2
jax: 0.10.0
libtpu: 0.0.40
codegen_flags: <defaults>
</compile_context>

<pallas_src>
from functools import partial

import jax
import jax.numpy as jnp
from jax.experimental import pallas as pl
from jax.experimental.pallas import tpu as pltpu


def _round_up(x: int, m: int) -> int:
    return (x + m - 1) // m * m


def residual_mlp_kernel(x_ref, w_ref, b_ref, o_ref):
    # x_ref: (TN, Dp) f32   w_ref: (Dp, Dp) bf16   b_ref: (1, Dp) f32
    # o_ref: (TN, Dp) f32
    x = x_ref[...]
    # Linear: x @ W^T + b  (W.T already formed + padded on the host side).
    h = jnp.dot(x.astype(jnp.bfloat16), w_ref[...],
                preferred_element_type=jnp.float32)
    h = h + b_ref[...]
    # LeakyReLU, negative_slope = 0.01 (PyTorch default).
    h = jnp.maximum(h, 0.01 * h)
    # Residual add.
    o_ref[...] = (x + h).astype(o_ref.dtype)


def _pick_row_tile(N: int, Dp: int, vmem_budget_bytes: int) -> int:
    """Largest multiple-of-8 row tile (<=1024) whose double-buffered x/out
    tiles plus the resident weight fit the VMEM budget."""
    n_rows = _round_up(N, 8)
    weight_bytes = Dp * Dp * 2 + Dp * 4
    # 2 buffers for x (f32) + 2 buffers for out (f32) per row tile.
    per_row_bytes = 4 * Dp * 4
    max_rows = max(8, (vmem_budget_bytes - weight_bytes) // per_row_bytes)
    tn = min(1024, n_rows, _round_up(max_rows, 8) - 8 if max_rows % 8 else max_rows)
    tn = max(8, (tn // 8) * 8)
    return tn


@partial(jax.jit, static_argnames=())
def residual_forward(x, w_t, b):
    """x: [N, D] float32; w_t: [D, D] (= W.T of torch Linear); b: [D]."""
    N, D = x.shape

    # Lane-dense layout: pad feature dim to a multiple of 128.
    Dp = _round_up(D, 128)
    vmem_budget = 24 * 1024 * 1024
    TN = _pick_row_tile(N, Dp, vmem_budget)
    Np = _round_up(N, TN)

    # Zero padding keeps semantics exact: padded K-columns contribute 0 to the
    # dot, padded bias is 0, LeakyReLU(0)=0, residual of padded x (=0) is 0,
    # so slicing [:N, :D] at the end recovers the exact result.
    x_pad = jnp.pad(x, ((0, Np - N), (0, Dp - D)))
    w_pad = jnp.pad(w_t, ((0, Dp - D), (0, Dp - D))).astype(jnp.bfloat16)
    b_pad = jnp.pad(b, (0, Dp - D)).astype(jnp.float32).reshape(1, Dp)

    grid = (Np // TN,)
    cost = pl.CostEstimate(
        flops=2 * Np * Dp * Dp + 4 * Np * Dp,
        transcendentals=0,
        bytes_accessed=2 * Np * Dp * 4 + Dp * Dp * 2 + Dp * 4,
    )

    out = pl.pallas_call(
        residual_mlp_kernel,
        out_shape=jax.ShapeDtypeStruct((Np, Dp), x.dtype),
        grid_spec=pltpu.PrefetchScalarGridSpec(
            num_scalar_prefetch=0,
            grid=grid,
            in_specs=[
                pl.BlockSpec((TN, Dp), lambda i: (i, 0)),   # x tile, streamed
                pl.BlockSpec((Dp, Dp), lambda i: (0, 0)),   # W resident in VMEM
                pl.BlockSpec((1, Dp), lambda i: (0, 0)),    # b resident in VMEM
            ],
            out_specs=pl.BlockSpec((TN, Dp), lambda i: (i, 0)),
        ),
        compiler_params=pltpu.CompilerParams(
            dimension_semantics=("parallel",),          # megacore on v7x
            vmem_limit_bytes=32 * 1024 * 1024,          # under v7x 64 MiB VMEM
        ),
        input_output_aliases={0: 0},                    # donate x_pad -> out
        cost_estimate=cost,
    )(x_pad, w_pad, b_pad)

    return out[:N, :D]


if __name__ == "__main__":
    key = jax.random.PRNGKey(0)
    kx, kw, kb = jax.random.split(key, 3)

    N, D = 8, 32  # 8 tokens, hidden dim 32 (small demo shape)
    x = jax.random.normal(kx, (N, D), dtype=jnp.float32)

    # Deterministic synthetic parameters for fn = Linear(D, D) + LeakyReLU.
    # torch.nn.Linear stores W as (out, in); we pass W.T = (in, out).
    w = jax.random.normal(kw, (D, D), dtype=jnp.float32) * (1.0 / jnp.sqrt(D))
    b = jax.random.normal(kb, (D,), dtype=jnp.float32) * 0.01
    w_t = w.T

    out = residual_forward(x, w_t, b)
    jax.block_until_ready(out)

    # Reference 1: mirror the kernel's precision (bf16 operands, f32 accum).
    h_bf = jnp.dot(x.astype(jnp.bfloat16), w_t.astype(jnp.bfloat16),
                   preferred_element_type=jnp.float32) + b[None, :]
    h_bf = jnp.maximum(h_bf, 0.01 * h_bf)
    ref_bf = x + h_bf
    assert jnp.allclose(out, ref_bf, atol=2e-3, rtol=2e-3), \
        "mismatch vs bf16-matmul reference"

    # Reference 2: pure f32 semantics of the PyTorch module (looser tol,
    # accounts for bf16 matmul operands).
    h_f32 = x @ w_t + b[None, :]
    h_f32 = jnp.where(h_f32 > 0, h_f32, 0.01 * h_f32)
    ref_f32 = x + h_f32
    assert jnp.allclose(out, ref_f32, atol=5e-2, rtol=5e-2), \
        "mismatch vs f32 PyTorch-semantics reference"

    print("KERNEL_OK")
</pallas_src>

<mosaic_0001>
module attributes {stable_mosaic.version = 11 : i64} {
  func.func @residual_mlp_kernel(%arg0: i32, %arg1: memref<8x128xf32, #tpu.memory_space<vmem>>, %arg2: memref<128x128xbf16, #tpu.memory_space<vmem>>, %arg3: memref<1x128xf32, #tpu.memory_space<vmem>>, %arg4: memref<8x128xf32, #tpu.memory_space<vmem>>) attributes {dimension_semantics = [#tpu.dimension_semantics<parallel>], iteration_bounds = array<i64: 1>, scalar_prefetch = 0 : i64, scratch_operands = 0 : i64, tpu.core_type = #tpu.core_type<tc>, window_params = [{transform_indices = @transform_0, window_bounds = array<i64: 8, 128>}, {pipeline_mode = #tpu.pipeline_mode<synchronous>, transform_indices = @transform_1, window_bounds = array<i64: 128, 128>}, {pipeline_mode = #tpu.pipeline_mode<synchronous>, transform_indices = @transform_2, window_bounds = array<i64: 1, 128>}, {transform_indices = @transform_3, window_bounds = array<i64: 8, 128>}]} {
    %c0 = arith.constant 0 : index
    %c0_0 = arith.constant 0 : index
    %0 = vector.load %arg1[%c0, %c0_0] : memref<8x128xf32, #tpu.memory_space<vmem>>, vector<8x128xf32>
    %1 = arith.truncf %0 : vector<8x128xf32> to vector<8x128xbf16>
    %c0_1 = arith.constant 0 : index
    %c0_2 = arith.constant 0 : index
    %2 = vector.load %arg2[%c0_1, %c0_2] : memref<128x128xbf16, #tpu.memory_space<vmem>>, vector<128x128xbf16>
    %cst = arith.constant dense<0.000000e+00> : vector<8x128xf32>
    %3 = tpu.matmul %1, %2, %cst {dimension_numbers = #tpu.dot_dimension_numbers<[1], [0], [0], [1], [0, 0, 1, 1], [], []>} : vector<8x128xbf16>, vector<128x128xbf16>, vector<8x128xf32> -> vector<8x128xf32>
    %c0_3 = arith.constant 0 : index
    %c0_4 = arith.constant 0 : index
    %4 = vector.load %arg3[%c0_3, %c0_4] : memref<1x128xf32, #tpu.memory_space<vmem>>, vector<1x128xf32>
    %5 = vector.broadcast %4 : vector<1x128xf32> to vector<8x128xf32>
    %6 = arith.addf %3, %5 : vector<8x128xf32>
    %cst_5 = arith.constant 0.00999999977 : f32
    %7 = vector.broadcast %cst_5 : f32 to vector<8x128xf32>
    %8 = arith.mulf %7, %6 : vector<8x128xf32>
    %9 = arith.maximumf %6, %8 : vector<8x128xf32>
    %10 = arith.addf %0, %9 : vector<8x128xf32>
    %c0_6 = arith.constant 0 : index
    %c0_7 = arith.constant 0 : index
    %11 = vector.load %arg4[%c0_6, %c0_7] : memref<8x128xf32, #tpu.memory_space<vmem>>, vector<8x128xf32>
    tpu.vector_store %arg4[%c0_6, %c0_7], %10 {strides = array<i32>} : memref<8x128xf32, #tpu.memory_space<vmem>>, vector<8x128xf32>,
    return
  }
  func.func @transform_0(%arg0: i32) -> (i32, i32) {
    %c0_i32 = arith.constant 0 : i32
    %c0_i32_0 = arith.constant 0 : i32
    return %arg0, %c0_i32 : i32, i32
  }
  func.func @transform_1(%arg0: i32) -> (i32, i32) {
    %c0_i32 = arith.constant 0 : i32
    %c0_i32_0 = arith.constant 0 : i32
    %c0_i32_1 = arith.constant 0 : i32
    return %c0_i32, %c0_i32_0 : i32, i32
  }
  func.func @transform_2(%arg0: i32) -> (i32, i32) {
    %c0_i32 = arith.constant 0 : i32
    %c0_i32_0 = arith.constant 0 : i32
    %c0_i32_1 = arith.constant 0 : i32
    return %c0_i32, %c0_i32_0 : i32, i32
  }
  func.func @transform_3(%arg0: i32) -> (i32, i32) {
    %c0_i32 = arith.constant 0 : i32
    %c0_i32_0 = arith.constant 0 : i32
    return %arg0, %c0_i32 : i32, i32
  }
}

</mosaic_0001>

<bundles_post_ra>
// kernel: residual_forward.1
= control target key start
LH: loop header
LB: loop body
LE: loop exit
PB: predicated region body
PF: predicated region fallthrough
CT: control target
= control target key end

     0   :  { %s199_s1 = inlined_call_operand.vmem [shape: bf16[128,128], index: 1, kind: input, shape index: {}]   ;;  %s200_s2 = inlined_call_operand.vmem [shape: f32[1,128], index: 2, kind: input, shape index: {}]   ;;  %s201_s0 = inlined_call_operand.vmem [shape: f32[8,128], index: 0, kind: input, shape index: {}, may-alias: {0,3}]   ;;  %s202_s3 = inlined_call_operand.vmem [shape: f32[8,128], index: 3, kind: output, shape index: {}, may-alias: {0,3}]  }
   0x1   :  { %v144_v0 = vld [vmem:[%s199_s1 + $0x38] sm:$0xff]  ;;  %v143_v1 = vld [vmem:[%s199_s1 + $0x30] sm:$0xff]  ;;  %v142_v2 = vld [vmem:[%s199_s1 + $0x28] sm:$0xff] }
   0x2   :  { %84 = vmatpush.bf16.msra.mxu0 %v144_v0  ;;  %v141_v3 = vld [vmem:[%s199_s1 + $0x20] sm:$0xff]  ;;  %v140_v4 = vld [vmem:[%s199_s1 + $0x18] sm:$0xff]  ;;  %v139_v5 = vld [vmem:[%s199_s1 + $0x10] sm:$0xff] }
   0x3   :  { %v138_v6 = vld [vmem:[%s199_s1 + $0x8] sm:$0xff]  ;;  %v137_v7 = vld [vmem:[%s199_s1] sm:$0xff] }
   0x4   :  { %v14_v8 = vld [vmem:[%s201_s0] sm:$0xff] }
   0x5   :  { %v15_v9 = vpack.c.bf16 %v14_v8, %v14_v8  ;;  %v145_v10 = vld [vmem:[%s200_s2] ss:$0 sm:$0xff] }
   0x6   :  { %85 = vmatpush.bf16.msra.mxu0 %v143_v1 }
   0xa   :  { %86 = vmatpush.bf16.msra.mxu0 %v142_v2 }
   0xe   :  { %87 = vmatpush.bf16.msra.mxu0 %v141_v3 }
  0x12   :  { %88 = vmatpush.bf16.msra.mxu0 %v140_v4 }
  0x16   :  { %89 = vmatpush.bf16.msra.mxu0 %v139_v5 }
  0x1a   :  { %90 = vmatpush.bf16.msra.mxu0 %v138_v6 }
  0x1e   :  { %91 = vmatpush.bf16.msra.mxu0 %v137_v7 }
  0x21   :  { %92 = vmatmul.bf16.vlgmr.msra.gmra.mxu0 %v15_v9 }
  0x9e   :  { %v93_v11 = vpop.f32.mrf.mxu0 }
  0x9f   :  { %v94_v12 = vadd.f32 %v145_v10, %v93_v11 }
  0xa1   :  { %v97_v13 = vmul.f32 0.01, %v94_v12 }
  0xa3   :  { %v98_v14 = vmax.f32 %v94_v12, %v97_v13 }
  0xa5   :  { %v99_v15 = vadd.f32 %v98_v14, %v14_v8 }
  0xa6   :  { %v95_v16 = vpop.f32.mrf.mxu0 }
  0xa7   :  { %100 = vst [vmem:[%s202_s3] sm:$0xff] %v99_v15 }

</bundles_post_ra>
